<compile_context>
chip_gen: v5e
topology: v5e:2x2
jax: 0.10.0
libtpu: 0.0.40
codegen_flags: <defaults>
</compile_context>

<pallas_src>
import functools
import math

import jax
import jax.numpy as jnp
from jax.experimental import pallas as pl
from jax.experimental.pallas import tpu as pltpu


def _round_up(x: int, m: int) -> int:
    return ((x + m - 1) // m) * m


def _token_embedding_kernel(ids_ref, emb_hbm, out_ref, buf, sem, *,
                            scale, block_tokens, vocab):
    # ids_ref : (n_pad,)            int32 token ids             (SMEM, prefetched)
    # emb_hbm : (vocab, emb)        embedding table             (HBM, no auto-DMA)
    # out_ref : (block_tokens, emb) output tile                 (VMEM)
    # buf     : (block_tokens, emb) gather landing buffer       (VMEM scratch)
    # sem     : ()                  DMA completion semaphore
    base = pl.program_id(0) * block_tokens

    def row_copy(r):
        tok = ids_ref[base + r]
        # Clamp so padded / out-of-range ids never drive an OOB HBM DMA.
        # (nn.Embedding would raise on OOB ids; here they read a valid row.)
        tok = jnp.clip(tok, 0, vocab - 1)
        return pltpu.make_async_copy(emb_hbm.at[tok], buf.at[r], sem)

    # Issue every row gather for this tile so all HBM latencies overlap ...
    @pl.loop(0, block_tokens)
    def _issue(r):
        row_copy(r).start()

    # ... then drain them (same semaphore, one wait per equal-sized copy).
    @pl.loop(0, block_tokens)
    def _drain(r):
        row_copy(r).wait()

    # Single scaled, lane-dense block store — the only VPU work per tile.
    out_ref[...] = (buf[...] * scale).astype(out_ref.dtype)


def token_embedding(tokens: jax.Array, emb_table: jax.Array,
                    *, max_block_tokens: int = 512) -> jax.Array:
    """Pallas equivalent of nn.Embedding(tokens.long()) * sqrt(emb_size)."""
    vocab, emb = emb_table.shape
    scale = math.sqrt(float(emb))

    orig_shape = tokens.shape
    ids = tokens.reshape(-1).astype(jnp.int32)
    n = ids.shape[0]

    # Tile size: multiple of 8 (sublanes), at most max_block_tokens tokens.
    block_tokens = min(max_block_tokens, _round_up(n, 8))
    num_blocks = pl.cdiv(n, block_tokens)
    n_pad = num_blocks * block_tokens
    if n_pad != n:
        # Only the (tiny) id vector is padded; the output is neither padded
        # nor sliced — the partial last tile is masked by Pallas on writeback.
        ids = jnp.concatenate([ids, jnp.zeros((n_pad - n,), jnp.int32)])

    itemsize = jnp.dtype(emb_table.dtype).itemsize
    tile_bytes = block_tokens * emb * itemsize

    kernel = functools.partial(_token_embedding_kernel, scale=scale,
                               block_tokens=block_tokens, vocab=vocab)

    out = pl.pallas_call(
        kernel,
        out_shape=jax.ShapeDtypeStruct((n, emb), emb_table.dtype),
        grid_spec=pltpu.PrefetchScalarGridSpec(
            num_scalar_prefetch=1,          # token ids -> SMEM
            grid=(num_blocks,),
            in_specs=[
                # Embedding table stays in HBM; rows are gathered by manual DMA.
                pl.BlockSpec(memory_space=pl.ANY),
            ],
            out_specs=pl.BlockSpec((block_tokens, emb), lambda i, ids: (i, 0)),
            scratch_shapes=[
                pltpu.VMEM((block_tokens, emb), emb_table.dtype),
                pltpu.SemaphoreType.DMA(()),
            ],
        ),
        compiler_params=pltpu.CompilerParams(
            # Token blocks are independent -> shard across TCs on v7x megacore.
            dimension_semantics=("parallel",),
            # Scratch + double-buffered output tile + headroom (table is NOT
            # in VMEM anymore, so this is tiny and vocab-independent).
            vmem_limit_bytes=max(16 << 20, 8 * tile_bytes),
        ),
        cost_estimate=pl.CostEstimate(
            flops=n * emb,                                   # the sqrt(emb) scale
            transcendentals=0,
            bytes_accessed=2 * n * emb * itemsize + n_pad * 4,
        ),
    )(ids, emb_table)

    return out.reshape(*orig_shape, emb)


if __name__ == "__main__":
    vocab_size = 64
    emb_size = 128
    batch, seq = 2, 8

    key = jax.random.PRNGKey(0)
    k_tok, k_emb = jax.random.split(key)

    tokens = jax.random.randint(k_tok, (batch, seq), 0, vocab_size, dtype=jnp.int32)
    # deterministic "parameter" init (synthetic, roughly like nn.Embedding's N(0,1))
    emb_table = jax.random.normal(k_emb, (vocab_size, emb_size), dtype=jnp.float32)

    out = token_embedding(tokens, emb_table)
    out = jax.block_until_ready(out)

    # pure-JAX reference: embedding lookup * sqrt(emb_size)
    ref = jnp.take(emb_table, tokens, axis=0) * math.sqrt(emb_size)
    assert out.shape == (batch, seq, emb_size)
    # True gather: same f32 rows, same f32 scale -> tight tolerance.
    assert jnp.allclose(out, ref, atol=1e-6, rtol=1e-6)

    print("KERNEL_OK")
</pallas_src>

<mosaic_0001>
module attributes {stable_mosaic.version = 11 : i64} {
  func.func @_token_embedding_kernel(%arg0: i32, %arg1: memref<16xi32, #tpu.memory_space<smem>>, %arg2: memref<64x128xf32, #tpu.memory_space<any>>, %arg3: memref<16x128xf32, #tpu.memory_space<vmem>>, %arg4: memref<16x128xf32, #tpu.memory_space<vmem>>, %arg5: memref<!tpu.dma_semaphore, #tpu.memory_space<semaphore_mem>>) attributes {dimension_semantics = [#tpu.dimension_semantics<parallel>], iteration_bounds = array<i64: 1>, scalar_prefetch = 1 : i64, scratch_operands = 2 : i64, tpu.core_type = #tpu.core_type<tc>, window_params = [{}, {transform_indices = @transform_1, window_bounds = array<i64: 16, 128>}]} {
    %c16_i32 = arith.constant 16 : i32
    %0 = arith.muli %arg0, %c16_i32 : i32
    %c0_i32 = arith.constant 0 : i32
    %c16_i32_0 = arith.constant 16 : i32
    %1 = arith.addi %c0_i32, %c16_i32_0 : i32
    %c1_i32 = arith.constant 1 : i32
    scf.for %arg6 = %c0_i32 to %1 step %c1_i32  : i32 {
      %c1_i32_9 = arith.constant 1 : i32
      %7 = arith.muli %arg6, %c1_i32_9 : i32
      %c0_i32_10 = arith.constant 0 : i32
      %8 = arith.addi %c0_i32_10, %7 : i32
      %9 = arith.addi %0, %8 : i32
      %10 = arith.index_cast %9 : i32 to index
      %11 = memref.load %arg1[%10] : memref<16xi32, #tpu.memory_space<smem>>
      %c0_i32_11 = arith.constant 0 : i32
      %c63_i32 = arith.constant 63 : i32
      %12 = arith.maxsi %c0_i32_11, %11 : i32
      %13 = arith.minsi %c63_i32, %12 : i32
      %c0_i32_12 = arith.constant 0 : i32
      %14 = tpu.memref_slice %arg2[%13, %c0_i32_12] : memref<64x128xf32, #tpu.memory_space<any>> -> memref<1x128xf32, #tpu.memory_space<any>>
      %15 = tpu.memref_squeeze %14 : memref<1x128xf32, #tpu.memory_space<any>> -> memref<128xf32, #tpu.memory_space<any>>
      %c0_i32_13 = arith.constant 0 : i32
      %16 = tpu.memref_slice %arg4[%8, %c0_i32_13] : memref<16x128xf32, #tpu.memory_space<vmem>> -> memref<1x128xf32, #tpu.memory_space<vmem>>
      %17 = tpu.memref_squeeze %16 : memref<1x128xf32, #tpu.memory_space<vmem>> -> memref<128xf32, #tpu.memory_space<vmem>>
      tpu.enqueue_dma source(%15 : memref<128xf32, #tpu.memory_space<any>>) target(%17 : memref<128xf32, #tpu.memory_space<vmem>>) target_semaphore(%arg5 : memref<!tpu.dma_semaphore, #tpu.memory_space<semaphore_mem>>)
    }
    %c16_i32_1 = arith.constant 16 : i32
    %c0_i32_2 = arith.constant 0 : i32
    %c16_i32_3 = arith.constant 16 : i32
    %2 = arith.addi %c0_i32_2, %c16_i32_3 : i32
    %c1_i32_4 = arith.constant 1 : i32
    scf.for %arg6 = %c0_i32_2 to %2 step %c1_i32_4  : i32 {
      %c1_i32_9 = arith.constant 1 : i32
      %7 = arith.muli %arg6, %c1_i32_9 : i32
      %c0_i32_10 = arith.constant 0 : i32
      %8 = arith.addi %c0_i32_10, %7 : i32
      %9 = arith.addi %0, %8 : i32
      %10 = arith.index_cast %9 : i32 to index
      %11 = memref.load %arg1[%10] : memref<16xi32, #tpu.memory_space<smem>>
      %c0_i32_11 = arith.constant 0 : i32
      %c63_i32 = arith.constant 63 : i32
      %12 = arith.maxsi %c0_i32_11, %11 : i32
      %13 = arith.minsi %c63_i32, %12 : i32
      %c0_i32_12 = arith.constant 0 : i32
      %14 = tpu.memref_slice %arg2[%13, %c0_i32_12] : memref<64x128xf32, #tpu.memory_space<any>> -> memref<1x128xf32, #tpu.memory_space<any>>
      %15 = tpu.memref_squeeze %14 : memref<1x128xf32, #tpu.memory_space<any>> -> memref<128xf32, #tpu.memory_space<any>>
      %c0_i32_13 = arith.constant 0 : i32
      %16 = tpu.memref_slice %arg4[%8, %c0_i32_13] : memref<16x128xf32, #tpu.memory_space<vmem>> -> memref<1x128xf32, #tpu.memory_space<vmem>>
      %17 = tpu.memref_squeeze %16 : memref<1x128xf32, #tpu.memory_space<vmem>> -> memref<128xf32, #tpu.memory_space<vmem>>
      tpu.wait_dma2 semaphore(%arg5 : memref<!tpu.dma_semaphore, #tpu.memory_space<semaphore_mem>>) src(%15 : memref<128xf32, #tpu.memory_space<any>>) dst(%17 : memref<128xf32, #tpu.memory_space<vmem>>)
    }
    %c16_i32_5 = arith.constant 16 : i32
    %c0 = arith.constant 0 : index
    %c0_6 = arith.constant 0 : index
    %3 = vector.load %arg4[%c0, %c0_6] : memref<16x128xf32, #tpu.memory_space<vmem>>, vector<16x128xf32>
    %cst = arith.constant 11.3137083 : f32
    %4 = vector.broadcast %cst : f32 to vector<16x128xf32>
    %5 = arith.mulf %3, %4 : vector<16x128xf32>
    %c0_7 = arith.constant 0 : index
    %c0_8 = arith.constant 0 : index
    %6 = vector.load %arg3[%c0_7, %c0_8] : memref<16x128xf32, #tpu.memory_space<vmem>>, vector<16x128xf32>
    tpu.vector_store %arg3[%c0_7, %c0_8], %5 {strides = array<i32>} : memref<16x128xf32, #tpu.memory_space<vmem>>, vector<16x128xf32>,
    return
  }
  func.func @transform_1(%arg0: i32, %arg1: memref<16xi32, #tpu.memory_space<smem>>) -> (i32, i32) {
    %c0_i32 = arith.constant 0 : i32
    %c0_i32_0 = arith.constant 0 : i32
    return %arg0, %c0_i32 : i32, i32
  }
}

</mosaic_0001>

<bundles_post_ra>
// kernel: tpu_custom_call.1
= control target key start
LH: loop header
LB: loop body
LE: loop exit
PB: predicated region body
PF: predicated region fallthrough
CT: control target
= control target key end

     0   :  { %s206_s12 = smov [#allocation5]   ;;  %s251_s0 = inlined_call_operand.hbm [shape: s32[16], index: 0, kind: input, shape index: {}]   ;;  %s252_s1 = inlined_call_operand.hbm [shape: f32[64,128], index: 1, kind: input, shape index: {}]   ;;  %s253_s2 = inlined_call_operand.hbm [shape: f32[16,128], index: 2, kind: output, shape index: {}]  }
   0x1   :  { %s8_s11 = sshll.u32 %s251_s0, 4  ;;  %s9_s11 = int_to_ptr.hbm [resolvable:$true] %s8_s11 }
   0x2   :  { %11 = dma.hbm_to_smem %s9_s11, 16, %s206_s12, [#allocation4] }
   0x3   :  { %192 = dma.done.wait [#allocation4], 16 }
   0x4   :  { %193 = vsyncadd [#allocation4], 4294967280 }
   0x5   :  { %14 = sfence }
   0x6   :  { %15 = vsyncpa [#allocation7], 0  ;;  %s229_s13 = smov 0  }
   0x7 LB: > { %s24_s14 = sld [smem:[#allocation5 + %s200_s13]]  ;;  %s30_s0 = scalar_lea.vmem [#allocation2], %s200_s13  ;;  %s200_s13 = sphi %s229_s13, %s22_s13  }
   0x8   : > { %s40_s15 = sshll.u32 %s30_s0, 4  ;;  %s140_s24 = scalar_lea.hbm %s252_s1, 64  ;;  %s41_s15 = int_to_ptr.vmem [resolvable:$true] %s40_s15 }
   0xd   : > { %p25_p0 = scmp.gt.s32.totalorder %s24_s14, 0  ;;  %p96_p1 = scmp.lt.s32.totalorder %s24_s14, 63 }
   0xf   : > { %s255_s14 = smov (!%p25_p0, %s24_s14), 0 }
  0x10   : > { %s257_s14 = smov (!%p96_p1, %s255_s14), 63 }
  0x11   : > { %s29_s18 = scalar_lea.hbm %s252_s1, %s257_s14 }
  0x12   : > { %s38_s19 = sshll.u32 %s29_s18, 4  ;;  %s39_s19 = int_to_ptr.hbm [resolvable:$true] %s38_s19 }
  0x13   : > { %s136_s20 = sshra.s32 %s39_s19, 4  ;;  %s137_s20 = int_to_ptr.hbm [resolvable:$true] %s136_s20 }
  0x14   : > { %s138_s21 = scalar_lea.hbm %s137_s20, 1  ;;  %p141_p3 = scmp.lt.s32.totalorder %s137_s20, %s252_s1 }
  0x15   : > { %p139_p2 = scmp.ne.s32.totalorder %s137_s20, %s138_s21  ;;  %p142_p4 = scmp.lt.s32.totalorder %s140_s24, %s138_s21 }
  0x17   : > { %p143_p5 = por %p142_p4, %p141_p3 }
  0x19   : > { %p144_p6 = pnand %p143_p5, %p139_p2 }
  0x1b   : > { %147 = shalt.err (!%p144_p6)  }
  0x1c   : > { %s148_s27 = sshra.s32 %s41_s15, 4  ;;  %s207_s29 = smov [#allocation2]   ;;  %s149_s27 = int_to_ptr.vmem [resolvable:$true] %s148_s27 }
  0x1d   : > { %s150_s28 = scalar_lea.vmem %s149_s27, 1  ;;  %s152_s30 = scalar_lea.vmem %s207_s29, 16 }
  0x1e   : > { %p151_p7 = scmp.ne.s32.totalorder %s149_s27, %s150_s28  ;;  %p153_p8 = scmp.lt.s32.totalorder %s149_s27, [#allocation2] }
  0x1f   : > { %p154_p9 = scmp.lt.s32.totalorder %s152_s30, %s150_s28 }
  0x21   : > { %p155_p10 = por %p154_p9, %p153_p8 }
  0x23   : > { %p156_p11 = pnand %p155_p10, %p151_p7 }
  0x25   : > { %159 = shalt.err (!%p156_p11)  }
  0x26   : > { %43 = dma.hbm_to_vmem [thread:$0]  %s39_s19, 16, %s41_s15, [#allocation3] }
  0x27   : > { %s22_s13 = sadd.s32 1, %s200_s13  }
  0x28   : > { %p19_p12 = scmp.ge.s32.totalorder %s22_s13, 16  }
  0x29   :  { %s202_s3 = smov (%p19_p12), 0  }
  0x2a   :  { %21 = sbr.rel (!%p19_p12) target bundleno = 7 (0x7), region = 40 }
  0x2f LB: > { %194 = dma.done.wait [#allocation3], 16  ;;  %s204_s3 = sphi %s202_s3, %s49_s3  }
  0x30   : > { %195 = vsyncadd [#allocation3], 4294967280  ;;  %s49_s3 = sadd.s32 1, %s204_s3  }
  0x31   : > { %p46_p13 = scmp.ge.s32.totalorder %s49_s3, 16  }
  0x32   :  { %v54_v0 = vld [vmem:[#allocation2] sm:$0xff] (%p46_p13)  ;;  %v55_v1 = vld [vmem:[#allocation2 + $0x8] sm:$0xff] (%p46_p13)  ;;  %s66_s6 = sshll.u32 (%p46_p13), %s253_s2, 4  ;;  %s208_s7 = smov (%p46_p13), [#allocation6]   ;;  %s67_s6 = int_to_ptr.hbm [resolvable:$true] %s66_s6 }
  0x33   :  { %48 = sbr.rel (!%p46_p13) target bundleno = 47 (0x2f), region = 51  ;;  %v56_v2 = vmul.f32 (%p46_p13), 11.313708, %v54_v0  ;;  %v57_v3 = vmul.f32 (%p46_p13), 11.313708, %v55_v1  ;;  %s64_s8 = sshll.u32 (%p46_p13), %s208_s7, 4  ;;  %s65_s8 = int_to_ptr.vmem [resolvable:$true] %s64_s8 }
  0x34   :  { %s209_s1 = smov (%p46_p13), 128   ;;  %s210_s9 = smov (%p46_p13), 8  }
  0x35   :  { %58 = vst [vmem:[#allocation6] sm:$0xff] (%p46_p13), %v56_v2 }
  0x36   :  { %59 = vst [vmem:[#allocation6 + $0x8] sm:$0xff] (%p46_p13), %v57_v3 }
  0x37   :  { %72 = dma.vmem_to_hbm [thread:$0]  (%p46_p13), %s65_s8, 256, %s67_s6, [#allocation7], %s209_s1, %s209_s1, %s210_s9  }
  0x38   :  { %196 = dma.done.wait [#allocation7], 256  }
  0x39   :  { %197 = vsyncadd [#allocation7], 4294967040 }
  0x3a   :  { %77 = vsyncpa [#allocation7], 1 }
  0x3b   :  { %78 = vsyncmov [#allocation3] }
  0x3e   :  { %s79_s10 = vpop.sfrf %78 }
  0x3f   :  { %p101_p0 = scmp.ne.s32.totalorder %s79_s10, 0 }
  0x41   :  { %83 = shalt.err (%p101_p0)  }

</bundles_post_ra>
